<compile_context>
chip_gen: v7x
topology: tpu7x:2x2x1
jax: 0.10.0
libtpu: 0.0.40
codegen_flags: <defaults>
</compile_context>

<pallas_src>
import jax
import jax.numpy as jnp
from jax.experimental import pallas as pl
from jax.experimental.pallas import tpu as pltpu

_LANE = 128


def _round_up(x, m):
    return (x + m - 1) // m * m


def _pad_to(a, target_shape):
    pads = [(0, t - s) for s, t in zip(a.shape, target_shape)]
    if all(p == (0, 0) for p in pads):
        return a
    return jnp.pad(a, pads)


def _sublane_pack(dtype):
    # rows per packed sublane group: 8 for f32, 16 for bf16, 32 for int8/fp8.
    return max(8, 32 // jnp.dtype(dtype).itemsize)


# ----------------------------------------------------------------------------
# Kernel: one block of token-sorted assignments through its expert's MLP.
# ----------------------------------------------------------------------------
def _moe_group_kernel(block_expert_ref, block_active_ref,       # SMEM (prefetch)
                      x_ref, gate_ref,                          # (TM,Din_p), (TM,1)
                      w1_ref, b1_ref, w2_ref, b2_ref, w3_ref, b3_ref,
                      out_ref):                                 # (TM, Dout_p)
    b = pl.program_id(0)

    @pl.when(block_active_ref[b] != 0)
    def _compute():
        x = x_ref[...]                                          # compute dtype
        h1 = jnp.dot(x, w1_ref[0], preferred_element_type=jnp.float32) + b1_ref[0]
        h1 = jnp.maximum(h1, 0.0).astype(x.dtype)
        h2 = jnp.dot(h1, w2_ref[0], preferred_element_type=jnp.float32) + b2_ref[0]
        h2 = jnp.maximum(h2, 0.0).astype(x.dtype)
        oe = jnp.dot(h2, w3_ref[0], preferred_element_type=jnp.float32) + b3_ref[0]
        # gate is per-row (padding rows have gate 0 -> zero contribution).
        out_ref[...] = (gate_ref[...] * oe).astype(out_ref.dtype)

    @pl.when(block_active_ref[b] == 0)
    def _zero():
        out_ref[...] = jnp.zeros_like(out_ref)


# ----------------------------------------------------------------------------
# One-time parameter preparation (transpose / pad / cast) -- amortize this.
# ----------------------------------------------------------------------------
def prepare_moe_params(params, *, compute_dtype=jnp.bfloat16):
    d_in, num_experts, hidden = params["mlp_w1"].shape
    d_out = params["mlp_w3"].shape[-1]
    d_in_p = _round_up(d_in, _LANE)
    h_p = _round_up(hidden, _LANE)
    d_out_p = _round_up(d_out, _LANE)

    w1 = jnp.transpose(params["mlp_w1"], (1, 0, 2))       # (E, Din, H)
    w2 = jnp.transpose(params["mlp_w2"], (1, 0, 2))       # (E, H, H)
    w3 = jnp.transpose(params["mlp_w3"], (1, 0, 2))       # (E, H, Dout)

    prep = {
        # gate network stays f32 / unpadded -- routing is done in plain JAX.
        "gate_w": params["gate_w"].astype(jnp.float32),
        "gate_b": params["gate_b"].astype(jnp.float32),
        "gate_out_w": params["gate_out_w"].astype(jnp.float32),
        "gate_out_b": params["gate_out_b"].astype(jnp.float32),
        # expert MLP weights: expert-major, lane-padded, compute dtype.
        "w1": _pad_to(w1, (num_experts, d_in_p, h_p)).astype(compute_dtype),
        "w2": _pad_to(w2, (num_experts, h_p, h_p)).astype(compute_dtype),
        "w3": _pad_to(w3, (num_experts, h_p, d_out_p)).astype(compute_dtype),
        # biases stay f32 (added after the f32-accumulated matmuls); (E,1,H).
        "b1": _pad_to(params["mlp_b1"], (num_experts, h_p)).astype(jnp.float32)[:, None, :],
        "b2": _pad_to(params["mlp_b2"], (num_experts, h_p)).astype(jnp.float32)[:, None, :],
        "b3": _pad_to(params["mlp_b3"], (num_experts, d_out_p)).astype(jnp.float32)[:, None, :],
    }
    dims = dict(d_in=d_in, hidden=hidden, d_out=d_out, num_experts=num_experts,
                d_in_p=d_in_p, h_p=h_p, d_out_p=d_out_p,
                compute_dtype=compute_dtype)
    return prep, dims


# ----------------------------------------------------------------------------
# Forward pass.
# ----------------------------------------------------------------------------
def moe_pallas(x, prep, dims, *, num_selected_experts, block_m=512):
    """x: (M, input_dim). prep/dims from prepare_moe_params."""
    M, _ = x.shape
    E = dims["num_experts"]
    k = num_selected_experts
    d_in_p, h_p, d_out_p = dims["d_in_p"], dims["h_p"], dims["d_out_p"]
    d_out = dims["d_out"]
    cdt = dims["compute_dtype"]

    # ---- top-k gating (tiny) in plain JAX ----------------------------------
    xf = x.astype(jnp.float32)
    hg = jax.nn.relu(xf @ prep["gate_w"] + prep["gate_b"])
    logits = hg @ prep["gate_out_w"] + prep["gate_out_b"]
    vals, idxs = jax.lax.top_k(logits, k)                         # (M, k)
    gate_vals = jax.nn.softmax(vals, axis=-1)                     # (M, k)

    # ---- token-sorted grouped dispatch --------------------------------------
    pack = _sublane_pack(cdt)
    block_m_eff = max(pack, min(block_m, _round_up(M * k, pack)))
    block_m_eff = _round_up(block_m_eff, pack)

    n_assign = M * k
    # static upper bound on blocks: per-expert padding adds at most one extra
    # block per non-empty expert.
    num_blocks = (n_assign + block_m_eff - 1) // block_m_eff + min(E, n_assign)
    S = num_blocks * block_m_eff

    expert_flat = idxs.reshape(-1).astype(jnp.int32)              # (M*k,)
    token_flat = jnp.repeat(jnp.arange(M, dtype=jnp.int32), k)    # (M*k,)
    gate_flat = gate_vals.reshape(-1)                             # (M*k,)

    order = jnp.argsort(expert_flat)
    e_sorted = expert_flat[order]
    t_sorted = token_flat[order]
    g_sorted = gate_flat[order]

    counts = jnp.bincount(e_sorted, length=E).astype(jnp.int32)
    padded_counts = ((counts + block_m_eff - 1) // block_m_eff) * block_m_eff
    group_starts = jnp.concatenate(
        [jnp.zeros((1,), jnp.int32), jnp.cumsum(padded_counts)[:-1].astype(jnp.int32)])
    count_starts = jnp.concatenate(
        [jnp.zeros((1,), jnp.int32), jnp.cumsum(counts)[:-1].astype(jnp.int32)])
    rank = jnp.arange(n_assign, dtype=jnp.int32) - count_starts[e_sorted]
    dest = group_starts[e_sorted] + rank                          # unique slots

    x_feat = _pad_to(x.astype(cdt), (M, d_in_p))
    x_sorted = jnp.zeros((S, d_in_p), cdt).at[dest].set(x_feat[t_sorted])
    gate_sorted = jnp.zeros((S, 1), jnp.float32).at[dest, 0].set(g_sorted)
    tok_dest = jnp.zeros((S,), jnp.int32).at[dest].set(t_sorted)

    group_end = jnp.cumsum(padded_counts).astype(jnp.int32)       # (E,)
    blocks_used = group_end[-1] // block_m_eff                    # runtime scalar
    block_idx = jnp.arange(num_blocks, dtype=jnp.int32)
    block_expert = jnp.searchsorted(group_end, block_idx * block_m_eff,
                                    side="right").astype(jnp.int32)
    block_expert = jnp.minimum(block_expert, E - 1)
    block_active = (block_idx < blocks_used).astype(jnp.int32)

    # ---- generation-aware VMEM budget ---------------------------------------
    cbytes = jnp.dtype(cdt).itemsize
    weight_bytes = (d_in_p * h_p + h_p * h_p + h_p * d_out_p) * cbytes
    bias_bytes = (2 * h_p + d_out_p) * 4
    io_bytes = block_m_eff * (d_in_p * cbytes + _LANE * 4 + d_out_p * 4)
    vmem_est = 2 * (weight_bytes + bias_bytes + io_bytes)
    try:
        vmem_cap = int(getattr(pltpu.get_tpu_info(), "vmem_capacity_bytes", 64 << 20))
    except Exception:  # pragma: no cover - conservative fallback off-TPU
        vmem_cap = 64 << 20
    vmem_limit = int(min(max(vmem_est + (4 << 20), 32 << 20), vmem_cap * 7 // 8))

    # ---- BlockSpecs (scalar-prefetch refs are trailing index_map args) ------
    def x_map(b, be, ba):   return (b, 0)
    def g_map(b, be, ba):   return (b, 0)
    def w_map(b, be, ba):   return (be[b], 0, 0)
    def o_map(b, be, ba):   return (b, 0)

    out_sorted = pl.pallas_call(
        _moe_group_kernel,
        out_shape=jax.ShapeDtypeStruct((S, d_out_p), jnp.float32),
        grid_spec=pltpu.PrefetchScalarGridSpec(
            num_scalar_prefetch=2,
            grid=(num_blocks,),
            in_specs=[
                pl.BlockSpec((block_m_eff, d_in_p), x_map),        # x (sorted)
                pl.BlockSpec((block_m_eff, 1), g_map),             # per-row gate
                pl.BlockSpec((1, d_in_p, h_p), w_map),             # w1[e]
                pl.BlockSpec((1, 1, h_p), w_map),                  # b1[e]
                pl.BlockSpec((1, h_p, h_p), w_map),                # w2[e]
                pl.BlockSpec((1, 1, h_p), w_map),                  # b2[e]
                pl.BlockSpec((1, h_p, d_out_p), w_map),            # w3[e]
                pl.BlockSpec((1, 1, d_out_p), w_map),              # b3[e]
            ],
            out_specs=pl.BlockSpec((block_m_eff, d_out_p), o_map),
        ),
        compiler_params=pltpu.CompilerParams(
            dimension_semantics=("parallel",),
            vmem_limit_bytes=vmem_limit,
        ),
    )(block_expert, block_active, x_sorted, gate_sorted,
      prep["w1"], prep["b1"], prep["w2"], prep["b2"], prep["w3"], prep["b3"])

    # ---- scatter gated per-assignment outputs back to tokens ----------------
    out = jnp.zeros((M, d_out), jnp.float32).at[tok_dest].add(out_sorted[:, :d_out])
    return out.astype(x.dtype)


# ----------------------------------------------------------------------------
# Pure-JAX reference matching the Triton kernel semantics (f32 throughout).
# ----------------------------------------------------------------------------
def moe_reference(x, params, *, num_selected_experts):
    gw, gb = params["gate_w"], params["gate_b"]
    gow, gob = params["gate_out_w"], params["gate_out_b"]
    w1, b1 = params["mlp_w1"], params["mlp_b1"]   # (Din,E,H), (E,H)
    w2, b2 = params["mlp_w2"], params["mlp_b2"]   # (H,E,H),   (E,H)
    w3, b3 = params["mlp_w3"], params["mlp_b3"]   # (H,E,Dout),(E,Dout)

    h = jax.nn.relu(x @ gw + gb)
    logits = h @ gow + gob
    vals, idxs = jax.lax.top_k(logits, num_selected_experts)
    gates = jax.nn.softmax(vals, axis=-1)

    h1 = jax.nn.relu(jnp.einsum("md,deh->meh", x, w1) + b1)
    h2 = jax.nn.relu(jnp.einsum("meh,hef->mef", h1, w2) + b2)
    oe = jnp.einsum("meh,heo->meo", h2, w3) + b3          # (M, E, Dout)
    sel = jnp.take_along_axis(oe, idxs[:, :, None], axis=1)
    return jnp.sum(sel * gates[:, :, None], axis=1)


if __name__ == "__main__":
    # small shapes consistent with the module's forward
    M = 48
    input_dim = 32
    output_dim = 32
    hidden_dim = 32
    num_experts = 8
    num_selected_experts = 2

    key = jax.random.PRNGKey(0)
    keys = jax.random.split(key, 11)
    scale = 0.1  # deterministic synthetic init (randn * 0.1)

    params = {
        "gate_w":     jax.random.normal(keys[0], (input_dim, hidden_dim), jnp.float32) * scale,
        "gate_b":     jax.random.normal(keys[1], (hidden_dim,), jnp.float32) * scale,
        "gate_out_w": jax.random.normal(keys[2], (hidden_dim, num_experts), jnp.float32) * scale,
        "gate_out_b": jax.random.normal(keys[3], (num_experts,), jnp.float32) * scale,
        "mlp_w1":     jax.random.normal(keys[4], (input_dim, num_experts, hidden_dim), jnp.float32) * scale,
        "mlp_b1":     jax.random.normal(keys[5], (num_experts, hidden_dim), jnp.float32) * scale,
        "mlp_w2":     jax.random.normal(keys[6], (hidden_dim, num_experts, hidden_dim), jnp.float32) * scale,
        "mlp_b2":     jax.random.normal(keys[7], (num_experts, hidden_dim), jnp.float32) * scale,
        "mlp_w3":     jax.random.normal(keys[8], (hidden_dim, num_experts, output_dim), jnp.float32) * scale,
        "mlp_b3":     jax.random.normal(keys[9], (num_experts, output_dim), jnp.float32) * scale,
    }
    x = jax.random.normal(keys[10], (M, input_dim), jnp.float32)

    ref = moe_reference(x, params, num_selected_experts=num_selected_experts)

    # --- f32 compute path: tight check against the pure-JAX reference -------
    prep32, dims32 = prepare_moe_params(params, compute_dtype=jnp.float32)
    fwd32 = jax.jit(lambda xx: moe_pallas(
        xx, prep32, dims32, num_selected_experts=num_selected_experts, block_m=32))
    out32 = jax.block_until_ready(fwd32(x))
    assert out32.shape == (M, output_dim)
    assert jnp.allclose(out32, ref, rtol=1e-4, atol=1e-4), (
        f"f32 max abs err {jnp.max(jnp.abs(out32 - ref))}")

    # --- bf16 compute path (default, MXU-friendly): looser tolerance --------
    prep16, dims16 = prepare_moe_params(params)  # bfloat16 weights/activations
    fwd16 = jax.jit(lambda xx: moe_pallas(
        xx, prep16, dims16, num_selected_experts=num_selected_experts, block_m=32))
    out16 = jax.block_until_ready(fwd16(x))
    assert out16.shape == (M, output_dim)
    assert jnp.allclose(out16, ref, rtol=3e-2, atol=3e-2), (
        f"bf16 max abs err {jnp.max(jnp.abs(out16 - ref))}")

    print("KERNEL_OK")
</pallas_src>

<mosaic_0001>
module attributes {stable_mosaic.version = 11 : i64} {
  func.func private @main(%arg0: i32) attributes {dimension_semantics = [#tpu.dimension_semantics<core_parallel>], iteration_bounds = array<i64: 2>, tpu.core_type = #tpu.core_type<sc_scalar_subcore>, window_params = []} {
    return
  }
}

module attributes {stable_mosaic.version = 11 : i64} {
  func.func private @main(%arg0: i32) attributes {dimension_semantics = [#tpu.dimension_semantics<core_parallel>], iteration_bounds = array<i64: 2>, tpu.core_type = #tpu.core_type<sc_scalar_subcore>, window_params = []} {
    return
  }
}

module attributes {stable_mosaic.version = 11 : i64} {
  func.func @_moe_group_kernel(%arg0: i32, %arg1: memref<11xi32, #tpu.memory_space<smem>>, %arg2: memref<11xi32, #tpu.memory_space<smem>>, %arg3: memref<32x128xf32, #tpu.memory_space<vmem>>, %arg4: memref<32x1xf32, #tpu.memory_space<vmem>>, %arg5: memref<1x128x128xf32, #tpu.memory_space<vmem>>, %arg6: memref<1x1x128xf32, #tpu.memory_space<vmem>>, %arg7: memref<1x128x128xf32, #tpu.memory_space<vmem>>, %arg8: memref<1x1x128xf32, #tpu.memory_space<vmem>>, %arg9: memref<1x128x128xf32, #tpu.memory_space<vmem>>, %arg10: memref<1x1x128xf32, #tpu.memory_space<vmem>>, %arg11: memref<32x128xf32, #tpu.memory_space<vmem>>) attributes {dimension_semantics = [#tpu.dimension_semantics<parallel>], iteration_bounds = array<i64: 11>, scalar_prefetch = 2 : i64, scratch_operands = 0 : i64, tpu.core_type = #tpu.core_type<tc>, window_params = [{transform_indices = @transform_0, window_bounds = array<i64: 32, 128>}, {transform_indices = @transform_1, window_bounds = array<i64: 32, 1>}, {transform_indices = @transform_2, window_bounds = array<i64: 1, 128, 128>}, {transform_indices = @transform_3, window_bounds = array<i64: 1, 1, 128>}, {transform_indices = @transform_4, window_bounds = array<i64: 1, 128, 128>}, {transform_indices = @transform_5, window_bounds = array<i64: 1, 1, 128>}, {transform_indices = @transform_6, window_bounds = array<i64: 1, 128, 128>}, {transform_indices = @transform_7, window_bounds = array<i64: 1, 1, 128>}, {transform_indices = @transform_8, window_bounds = array<i64: 32, 128>}]} {
    %0 = arith.index_cast %arg0 : i32 to index
    %1 = memref.load %arg2[%0] : memref<11xi32, #tpu.memory_space<smem>>
    %c0_i32 = arith.constant 0 : i32
    %2 = arith.cmpi ne, %1, %c0_i32 : i32
    %3 = arith.extui %2 : i1 to i32
    %c0_i32_0 = arith.constant 0 : i32
    %4 = arith.cmpi ne, %3, %c0_i32_0 : i32
    scf.if %4 {
      %c0 = arith.constant 0 : index
      %c0_3 = arith.constant 0 : index
      %10 = vector.load %arg3[%c0, %c0_3] : memref<32x128xf32, #tpu.memory_space<vmem>>, vector<32x128xf32>
      %c0_4 = arith.constant 0 : index
      %c0_5 = arith.constant 0 : index
      %c0_6 = arith.constant 0 : index
      %11 = vector.load %arg5[%c0_4, %c0_5, %c0_6] : memref<1x128x128xf32, #tpu.memory_space<vmem>>, vector<1x128x128xf32>
      %12 = vector.shape_cast %11 : vector<1x128x128xf32> to vector<128x128xf32>
      %cst = arith.constant dense<0.000000e+00> : vector<32x128xf32>
      %13 = tpu.matmul %10, %12, %cst {dimension_numbers = #tpu.dot_dimension_numbers<[1], [0], [0], [1], [0, 0, 1, 1], [], []>} : vector<32x128xf32>, vector<128x128xf32>, vector<32x128xf32> -> vector<32x128xf32>
      %c0_7 = arith.constant 0 : index
      %c0_8 = arith.constant 0 : index
      %c0_9 = arith.constant 0 : index
      %14 = vector.load %arg6[%c0_7, %c0_8, %c0_9] : memref<1x1x128xf32, #tpu.memory_space<vmem>>, vector<1x1x128xf32>
      %15 = vector.shape_cast %14 : vector<1x1x128xf32> to vector<1x128xf32>
      %16 = vector.broadcast %15 : vector<1x128xf32> to vector<32x128xf32>
      %17 = arith.addf %13, %16 : vector<32x128xf32>
      %cst_10 = arith.constant 0.000000e+00 : f32
      %18 = vector.broadcast %cst_10 : f32 to vector<32x128xf32>
      %19 = arith.maximumf %17, %18 : vector<32x128xf32>
      %c0_11 = arith.constant 0 : index
      %c0_12 = arith.constant 0 : index
      %c0_13 = arith.constant 0 : index
      %20 = vector.load %arg7[%c0_11, %c0_12, %c0_13] : memref<1x128x128xf32, #tpu.memory_space<vmem>>, vector<1x128x128xf32>
      %21 = vector.shape_cast %20 : vector<1x128x128xf32> to vector<128x128xf32>
      %cst_14 = arith.constant dense<0.000000e+00> : vector<32x128xf32>
      %22 = tpu.matmul %19, %21, %cst_14 {dimension_numbers = #tpu.dot_dimension_numbers<[1], [0], [0], [1], [0, 0, 1, 1], [], []>} : vector<32x128xf32>, vector<128x128xf32>, vector<32x128xf32> -> vector<32x128xf32>
      %c0_15 = arith.constant 0 : index
      %c0_16 = arith.constant 0 : index
      %c0_17 = arith.constant 0 : index
      %23 = vector.load %arg8[%c0_15, %c0_16, %c0_17] : memref<1x1x128xf32, #tpu.memory_space<vmem>>, vector<1x1x128xf32>
      %24 = vector.shape_cast %23 : vector<1x1x128xf32> to vector<1x128xf32>
      %25 = vector.broadcast %24 : vector<1x128xf32> to vector<32x128xf32>
      %26 = arith.addf %22, %25 : vector<32x128xf32>
      %cst_18 = arith.constant 0.000000e+00 : f32
      %27 = vector.broadcast %cst_18 : f32 to vector<32x128xf32>
      %28 = arith.maximumf %26, %27 : vector<32x128xf32>
      %c0_19 = arith.constant 0 : index
      %c0_20 = arith.constant 0 : index
      %c0_21 = arith.constant 0 : index
      %29 = vector.load %arg9[%c0_19, %c0_20, %c0_21] : memref<1x128x128xf32, #tpu.memory_space<vmem>>, vector<1x128x128xf32>
      %30 = vector.shape_cast %29 : vector<1x128x128xf32> to vector<128x128xf32>
      %cst_22 = arith.constant dense<0.000000e+00> : vector<32x128xf32>
      %31 = tpu.matmul %28, %30, %cst_22 {dimension_numbers = #tpu.dot_dimension_numbers<[1], [0], [0], [1], [0, 0, 1, 1], [], []>} : vector<32x128xf32>, vector<128x128xf32>, vector<32x128xf32> -> vector<32x128xf32>
      %c0_23 = arith.constant 0 : index
      %c0_24 = arith.constant 0 : index
      %c0_25 = arith.constant 0 : index
      %32 = vector.load %arg10[%c0_23, %c0_24, %c0_25] : memref<1x1x128xf32, #tpu.memory_space<vmem>>, vector<1x1x128xf32>
      %33 = vector.shape_cast %32 : vector<1x1x128xf32> to vector<1x128xf32>
      %34 = vector.broadcast %33 : vector<1x128xf32> to vector<32x128xf32>
      %35 = arith.addf %31, %34 : vector<32x128xf32>
      %c0_26 = arith.constant 0 : index
      %c0_27 = arith.constant 0 : index
      %36 = vector.load %arg4[%c0_26, %c0_27] : memref<32x1xf32, #tpu.memory_space<vmem>>, vector<32x1xf32>
      %37 = vector.broadcast %36 : vector<32x1xf32> to vector<32x128xf32>
      %38 = arith.mulf %37, %35 : vector<32x128xf32>
      %c0_28 = arith.constant 0 : index
      %c0_29 = arith.constant 0 : index
      %39 = vector.load %arg11[%c0_28, %c0_29] : memref<32x128xf32, #tpu.memory_space<vmem>>, vector<32x128xf32>
      tpu.vector_store %arg11[%c0_28, %c0_29], %38 {strides = array<i32>} : memref<32x128xf32, #tpu.memory_space<vmem>>, vector<32x128xf32>,
    } else {
    }
    %5 = arith.index_cast %arg0 : i32 to index
    %6 = memref.load %arg2[%5] : memref<11xi32, #tpu.memory_space<smem>>
    %c0_i32_1 = arith.constant 0 : i32
    %7 = arith.cmpi eq, %6, %c0_i32_1 : i32
    %8 = arith.extui %7 : i1 to i32
    %c0_i32_2 = arith.constant 0 : i32
    %9 = arith.cmpi ne, %8, %c0_i32_2 : i32
    scf.if %9 {
      %cst = arith.constant 0.000000e+00 : f32
      %10 = vector.broadcast %cst : f32 to vector<32x128xf32>
      %c0 = arith.constant 0 : index
      %c0_3 = arith.constant 0 : index
      %11 = vector.load %arg11[%c0, %c0_3] : memref<32x128xf32, #tpu.memory_space<vmem>>, vector<32x128xf32>
      tpu.vector_store %arg11[%c0, %c0_3], %10 {strides = array<i32>} : memref<32x128xf32, #tpu.memory_space<vmem>>, vector<32x128xf32>,
    } else {
    }
    return
  }
  func.func @transform_0(%arg0: i32, %arg1: memref<11xi32, #tpu.memory_space<smem>>, %arg2: memref<11xi32, #tpu.memory_space<smem>>) -> (i32, i32) {
    %c0_i32 = arith.constant 0 : i32
    %c0_i32_0 = arith.constant 0 : i32
    return %arg0, %c0_i32 : i32, i32
  }
  func.func @transform_1(%arg0: i32, %arg1: memref<11xi32, #tpu.memory_space<smem>>, %arg2: memref<11xi32, #tpu.memory_space<smem>>) -> (i32, i32) {
    %c0_i32 = arith.constant 0 : i32
    %c0_i32_0 = arith.constant 0 : i32
    return %arg0, %c0_i32 : i32, i32
  }
  func.func @transform_2(%arg0: i32, %arg1: memref<11xi32, #tpu.memory_space<smem>>, %arg2: memref<11xi32, #tpu.memory_space<smem>>) -> (i32, i32, i32) {
    %0 = arith.index_cast %arg0 : i32 to index
    %1 = memref.load %arg1[%0] : memref<11xi32, #tpu.memory_space<smem>>
    %c0_i32 = arith.constant 0 : i32
    %c0_i32_0 = arith.constant 0 : i32
    %c0_i32_1 = arith.constant 0 : i32
    return %1, %c0_i32, %c0_i32_0 : i32, i32, i32
  }
  func.func @transform_3(%arg0: i32, %arg1: memref<11xi32, #tpu.memory_space<smem>>, %arg2: memref<11xi32, #tpu.memory_space<smem>>) -> (i32, i32, i32) {
    %0 = arith.index_cast %arg0 : i32 to index
    %1 = memref.load %arg1[%0] : memref<11xi32, #tpu.memory_space<smem>>
    %c0_i32 = arith.constant 0 : i32
    %c0_i32_0 = arith.constant 0 : i32
    %c0_i32_1 = arith.constant 0 : i32
    return %1, %c0_i32, %c0_i32_0 : i32, i32, i32
  }
  func.func @transform_4(%arg0: i32, %arg1: memref<11xi32, #tpu.memory_space<smem>>, %arg2: memref<11xi32, #tpu.memory_space<smem>>) -> (i32, i32, i32) {
    %0 = arith.index_cast %arg0 : i32 to index
    %1 = memref.load %arg1[%0] : memref<11xi32, #tpu.memory_space<smem>>
    %c0_i32 = arith.constant 0 : i32
    %c0_i32_0 = arith.constant 0 : i32
    %c0_i32_1 = arith.constant 0 : i32
    return %1, %c0_i32, %c0_i32_0 : i32, i32, i32
  }
  func.func @transform_5(%arg0: i32, %arg1: memref<11xi32, #tpu.memory_space<smem>>, %arg2: memref<11xi32, #tpu.memory_space<smem>>) -> (i32, i32, i32) {
    %0 = arith.index_cast %arg0 : i32 to index
    %1 = memref.load %arg1[%0] : memref<11xi32, #tpu.memory_space<smem>>
    %c0_i32 = arith.constant 0 : i32
    %c0_i32_0 = arith.constant 0 : i32
    %c0_i32_1 = arith.constant 0 : i32
    return %1, %c0_i32, %c0_i32_0 : i32, i32, i32
  }
  func.func @transform_6(%arg0: i32, %arg1: memref<11xi32, #tpu.memory_space<smem>>, %arg2: memref<11xi32, #tpu.memory_space<smem>>) -> (i32, i32, i32) {
    %0 = arith.index_cast %arg0 : i32 to index
    %1 = memref.load %arg1[%0] : memref<11xi32, #tpu.memory_space<smem>>
    %c0_i32 = arith.constant 0 : i32
    %c0_i32_0 = arith.constant 0 : i32
    %c0_i32_1 = arith.constant 0 : i32
    return %1, %c0_i32, %c0_i32_0 : i32, i32, i32
  }
  func.func @transform_7(%arg0: i32, %arg1: memref<11xi32, #tpu.memory_space<smem>>, %arg2: memref<11xi32, #tpu.memory_space<smem>>) -> (i32, i32, i32) {
    %0 = arith.index_cast %arg0 : i32 to index
    %1 = memref.load %arg1[%0] : memref<11xi32, #tpu.memory_space<smem>>
    %c0_i32 = arith.constant 0 : i32
    %c0_i32_0 = arith.constant 0 : i32
    %c0_i32_1 = arith.constant 0 : i32
    return %1, %c0_i32, %c0_i32_0 : i32, i32, i32
  }
  func.func @transform_8(%arg0: i32, %arg1: memref<11xi32, #tpu.memory_space<smem>>, %arg2: memref<11xi32, #tpu.memory_space<smem>>) -> (i32, i32) {
    %c0_i32 = arith.constant 0 : i32
    %c0_i32_0 = arith.constant 0 : i32
    return %arg0, %c0_i32 : i32, i32
  }
}

</mosaic_0001>

<bundles_post_ra>
// kernel: custom-call
= control target key start
LH: loop header
LB: loop body
LE: loop exit
PB: predicated region body
PF: predicated region fallthrough
CT: control target
= control target key end

     0   :  { %s6_s0 = inlined_call_operand.vmem [shape: u32[11], index: 0, kind: output, shape index: {}]  }

// kernel: _lambda_.1
= control target key start
LH: loop header
LB: loop body
LE: loop exit
PB: predicated region body
PF: predicated region fallthrough
CT: control target
= control target key end

     0   :  { %s1575_s0 = inlined_call_operand.vmem [shape: s32[11], index: 0, kind: input, shape index: {}]   ;;  %s1576_s2 = inlined_call_operand.vmem [shape: f32[352,128], index: 2, kind: input, shape index: {}]   ;;  %s1577_s3 = inlined_call_operand.vmem [shape: f32[352,1], index: 3, kind: input, shape index: {}]   ;;  %s1578_s4 = inlined_call_operand.vmem [shape: f32[8,128,128], index: 4, kind: input, shape index: {}]   ;;  %s1579_s5 = inlined_call_operand.vmem [shape: f32[8,1,128], index: 5, kind: input, shape index: {}]   ;;  %s1580_s6 = inlined_call_operand.vmem [shape: f32[8,128,128], index: 6, kind: input, shape index: {}]   ;;  %s1581_s7 = inlined_call_operand.vmem [shape: f32[8,1,128], index: 7, kind: input, shape index: {}]   ;;  %s1582_s8 = inlined_call_operand.vmem [shape: f32[8,128,128], index: 8, kind: input, shape index: {}]   ;;  %s1583_s9 = inlined_call_operand.vmem [shape: f32[8,1,128], index: 9, kind: input, shape index: {}]   ;;  %s1584_s10 = inlined_call_operand.vmem [shape: f32[352,128], index: 10, kind: output, shape index: {}]   ;;  %s1585_s1 = inlined_call_operand.vmem [shape: s32[11], index: 1, kind: input, shape index: {}]  }
   0x1   :  { %1586 = sst [smem:[#allocation6_spill]] %s1576_s2  ;;  %s15_s15 = sshll.u32 %s1575_s0, 4  ;;  %s16_s15 = int_to_ptr.vmem [resolvable:$true] %s15_s15 }
   0x2   :  { %1587 = sst [smem:[#allocation7_spill]] %s1577_s3  ;;  %s19_s18 = sshll.u32 %s1585_s1, 4  ;;  %s20_s18 = int_to_ptr.vmem [resolvable:$true] %s19_s18 }
   0x3   :  { %s1327_s19 = scalar_lea.vmem %s16_s15, 16  ;;  %p1332_p1 = scmp.lt.s32.totalorder %s16_s15, %s16_s15 }
   0x4   :  { %p1328_p0 = scmp.ne.s32.totalorder %s16_s15, %s1327_s19  ;;  %p1333_p2 = scmp.lt.s32.totalorder %s1327_s19, %s1327_s19 }
   0x6   :  { %p1334_p3 = por %p1333_p2, %p1332_p1 }
   0x8   :  { %p1335_p4 = pnand %p1334_p3, %p1328_p0 }
   0xa   :  { %1338 = shalt.err (!%p1335_p4)  }
   0xb   :  { %s1361_s20 = smov [#allocation3]   ;;  %s1339_s21 = scalar_lea.vmem %s20_s18, 16 }
   0xc   :  { %18 = dma.vmem_to_smem %s16_s15, 16, %s1361_s20, [#allocation2] }
   0xd   :  { %p1340_p5 = scmp.ne.s32.totalorder %s20_s18, %s1339_s21  ;;  %p1344_p6 = scmp.lt.s32.totalorder %s20_s18, %s20_s18 }
   0xe   :  { %p1345_p7 = scmp.lt.s32.totalorder %s1339_s21, %s1339_s21 }
  0x10   :  { %p1346_p8 = por %p1345_p7, %p1344_p6 }
  0x12   :  { %p1347_p9 = pnand %p1346_p8, %p1340_p5 }
  0x14   :  { %1350 = shalt.err (!%p1347_p9)  }
  0x15   :  { %s1362_s0 = smov [#allocation4]  }
  0x16   :  { %22 = dma.vmem_to_smem %s20_s18, 16, %s1362_s0, [#allocation2] }
  0x17   :  { %1355 = dma.done.wait [#allocation2], 32 }
  0x18   :  { %1356 = vsyncadd [#allocation2], 4294967264 }
  0x19   :  { %24 = sfence }
  0x1a   :  { %s1426_s1 = smov 0  }
  0x1b LB: > { %s1432_s22 = sadd.s32 4294967295, %s1359_s1   ;;  %p1004_p10 = scmp.ge.s32.totalorder %s1359_s1, 1  ;;  %s1359_s1 = sphi %s1426_s1, %s30_s1  }
  0x1c   : > { %p364_p11 = scmp.lt.s32.totalorder %s1359_s1, 12 }
  0x1e   : > { %p365_p12 = pnand %p1004_p10, %p364_p11 }
  0x1f   : > { %s1005_s23 = sshll.u32 (!%p365_p12), %s1432_s22, 2  ;;  %s445_s24 = sld [smem:[#allocation3 + %s1432_s22]] (!%p365_p12) }
  0x20   : > { %368 = sbr.rel (%p365_p12) target bundleno = 761 (0x2f9), region = 52  ;;  %p434_p13 = scmp.lt.s32.totalorder (!%p365_p12), %s1005_s23, 43 }
  0x21   : > { %s452_s25 = sld [smem:[#allocation3 + %s1432_s22]] (!%p365_p12) }
  0x22   : > { %s457_s26 = sld [smem:[#allocation3 + %s1432_s22]] (!%p365_p12) }
  0x23   : > { %s464_s27 = sld [smem:[#allocation3 + %s1432_s22]] (!%p365_p12) }
  0x24   : > { %s469_s28 = sld [smem:[#allocation3 + %s1432_s22]] (!%p365_p12) }
  0x25   : > { %s476_s29 = sld [smem:[#allocation3 + %s1432_s22]] (!%p365_p12)  ;;  %p446_p0 = scmp.lt.s32.totalorder (!%p365_p12), %s445_s24, 7 }
  0x26   : > { %s487_s11 = sld [smem:[#allocation4 + %s1432_s22]] (!%p365_p12) }
  0x27   : > { %s1592_s23 = smov (!%p434_p13, %s1005_s23), 43  ;;  %s1588_s2 = sld [smem:[#allocation6_spill]] }
  0x28   : > { %s1006_s30 = sshll.u32 %s1592_s23, 3  ;;  %s1589_s3 = sld [smem:[#allocation7_spill]] }
  0x29   : > { %p453_p1 = scmp.lt.s32.totalorder %s452_s25, 7  ;;  %p458_p2 = scmp.lt.s32.totalorder %s457_s26, 7 }
  0x2a   : > { %p465_p3 = scmp.lt.s32.totalorder %s464_s27, 7  ;;  %s1594_s24 = smov (!%p446_p0, %s445_s24), 7 }
  0x2b   : > { %s1596_s25 = smov (!%p453_p1, %s452_s25), 7  ;;  %s1024_s18 = sshll.u32 %s1594_s24, 7 }
  0x2c   : > { %p470_p4 = scmp.lt.s32.totalorder %s469_s28, 7  ;;  %s1459_s21 = scalar_lea.vmem %s1578_s4, %s1024_s18 }
  0x2d   : > { %s1447_s14 = scalar_lea.vmem %s1588_s2, %s1006_s30  ;;  %s1598_s26 = smov (!%p458_p2, %s457_s26), 7 }
  0x2e   : > { %s1452_s17 = scalar_lea.vmem %s1589_s3, %s1006_s30  ;;  %s1600_s27 = smov (!%p465_p3, %s464_s27), 7 }
  0x2f   : > { %s1025_s13 = sshll.u32 %s1598_s26, 7  ;;  %p477_p5 = scmp.lt.s32.totalorder %s476_s29, 7 }
  0x30   : > { %s1470_s24 = scalar_lea.vmem %s1580_s6, %s1025_s13  ;;  %s467_s18 = scalar_lea.vmem %s1581_s7, %s1600_s27 }
  0x31   : > { %s1602_s28 = smov (!%p470_p4, %s469_s28), 7  ;;  %s1604_s29 = smov (!%p477_p5, %s476_s29), 7 }
  0x32   : > { %s1026_s19 = sshll.u32 %s1602_s28, 7  ;;  %s1481_s23 = scalar_lea.vmem %s1584_s10, %s1006_s30 }
  0x33   : > { %s1486_s15 = scalar_lea.vmem %s1582_s8, %s1026_s19  ;;  %s479_s2 = scalar_lea.vmem %s1583_s9, %s1604_s29 }
  0x34   : > { %p1017_p6 = scmp.eq.s32.totalorder %s487_s11, 0 }
  0x35   : > { %v496_v0 = vld [vmem:[%s1459_s21] sm:$0xff] (!%p1017_p6)  ;;  %v497_v1 = vld [vmem:[%s1459_s21 + $0x8] sm:$0xff] (!%p1017_p6)  ;;  %v498_v2 = vld [vmem:[%s1459_s21 + $0x10] sm:$0xff] (!%p1017_p6)  ;;  %s1590_s30 = scalar_lea.vmem (!%p1017_p6), %s1579_s5, %s1596_s25 }
  0x36   : > { %491 = sbr.rel (%p1017_p6) target bundleno = 746 (0x2ea), region = 56  ;;  %v1201_v3 = vpack.c.bf16 (!%p1017_p6), %v497_v1, %v496_v0  ;;  %v499_v4 = vld [vmem:[%s1459_s21 + $0x18] sm:$0xff] (!%p1017_p6)  ;;  %v500_v6 = vld [vmem:[%s1459_s21 + $0x20] sm:$0xff] (!%p1017_p6)  ;;  %v501_v7 = vld [vmem:[%s1459_s21 + $0x28] sm:$0xff] (!%p1017_p6) }
  0x37   : > { %v1205_v5 = vpack.c.bf16 (!%p1017_p6), %v499_v4, %v498_v2  ;;  %v1209_v8 = vpack.c.bf16 (!%p1017_p6), %v501_v7, %v500_v6  ;;  %v492_v9 = vld [vmem:[%s1447_s14] sm:$0xff] (!%p1017_p6)  ;;  %v502_v10 = vld [vmem:[%s1459_s21 + $0x30] sm:$0xff] (!%p1017_p6)  ;;  %v503_v11 = vld [vmem:[%s1459_s21 + $0x38] sm:$0xff] (!%p1017_p6) }
  0x38   : > { %1202 = vmatprep.subr.bf16.mxu0 (!%p1017_p6), %v1201_v3  ;;  %1119 = vmatprep.mubr.f32.mxu0 (!%p1017_p6), %v492_v9  ;;  %v608_v12 = vld [vmem:[%s1470_s24] sm:$0xff] (!%p1017_p6)  ;;  %v609_v13 = vld [vmem:[%s1470_s24 + $0x8] sm:$0xff] (!%p1017_p6)  ;;  %v610_v14 = vld [vmem:[%s1470_s24 + $0x10] sm:$0xff] (!%p1017_p6)  ;;  %v1213_v18 = vpack.c.bf16 (!%p1017_p6), %v503_v11, %v502_v10 }
  0x39   : > { %1204 = vmatpush3.bf16.msra.mxu0 (!%p1017_p6), %v1201_v3  ;;  %v611_v15 = vld [vmem:[%s1470_s24 + $0x18] sm:$0xff] (!%p1017_p6)  ;;  %v1233_v16 = vpack.c.bf16 (!%p1017_p6), %v609_v13, %v608_v12  ;;  %v612_v19 = vld [vmem:[%s1470_s24 + $0x20] sm:$0xff] (!%p1017_p6)  ;;  %v613_v20 = vld [vmem:[%s1470_s24 + $0x28] sm:$0xff] (!%p1017_p6) }
  0x3a   : > { %1206 = vmatprep.subr.bf16.mxu0 (!%p1017_p6), %v1205_v5  ;;  %v1237_v17 = vpack.c.bf16 (!%p1017_p6), %v611_v15, %v610_v14  ;;  %v504_v21 = vld [vmem:[%s1459_s21 + $0x40] sm:$0xff] (!%p1017_p6)  ;;  %v505_v22 = vld [vmem:[%s1459_s21 + $0x48] sm:$0xff] (!%p1017_p6)  ;;  %v1241_v23 = vpack.c.bf16 (!%p1017_p6), %v613_v20, %v612_v19  ;;  %v614_v25 = vld [vmem:[%s1470_s24 + $0x30] sm:$0xff] (!%p1017_p6) }
  0x3b   : > { %1234 = vmatprep.subr.bf16.mxu1 (!%p1017_p6), %v1233_v16  ;;  %v1217_v24 = vpack.c.bf16 (!%p1017_p6), %v505_v22, %v504_v21  ;;  %v615_v26 = vld [vmem:[%s1470_s24 + $0x38] sm:$0xff] (!%p1017_p6)  ;;  %v506_v27 = vld [vmem:[%s1459_s21 + $0x50] sm:$0xff] (!%p1017_p6)  ;;  %v616_v31 = vld [vmem:[%s1470_s24 + $0x40] sm:$0xff] (!%p1017_p6) }
  0x3c   : > { %1236 = vmatpush3.bf16.msra.mxu1 (!%p1017_p6), %v1233_v16  ;;  %v507_v28 = vld [vmem:[%s1459_s21 + $0x58] sm:$0xff] (!%p1017_p6)  ;;  %v1245_v29 = vpack.c.bf16 (!%p1017_p6), %v615_v26, %v614_v25  ;;  %v617_v32 = vld [vmem:[%s1470_s24 + $0x48] sm:$0xff] (!%p1017_p6)  ;;  %v508_v33 = vld [vmem:[%s1459_s21 + $0x60] sm:$0xff] (!%p1017_p6) }
  0x3d   : > { %1208 = vmatpush3.bf16.msra.mxu0 %v1205_v5  ;;  %1238 = vmatprep.subr.bf16.mxu1 %v1237_v17  ;;  %v1221_v30 = vpack.c.bf16 %v507_v28, %v506_v27  ;;  %v509_v34 = vld [vmem:[%s1459_s21 + $0x68] sm:$0xff]  ;;  %v1249_v35 = vpack.c.bf16 %v617_v32, %v616_v31  ;;  %v618_v37 = vld [vmem:[%s1470_s24 + $0x50] sm:$0xff]  ;;  %v619_v38 = vld [vmem:[%s1470_s24 + $0x58] sm:$0xff]  ;;  %v1363_v27 = vmov 0  }
  0x3e   : > { %1210 = vmatprep.subr.bf16.mxu0 %v1209_v8  ;;  %v1225_v36 = vpack.c.bf16 %v509_v34, %v508_v33  ;;  %v510_v39 = vld [vmem:[%s1459_s21 + $0x70] sm:$0xff]  ;;  %v511_v40 = vld [vmem:[%s1459_s21 + $0x78] sm:$0xff]  ;;  %v1253_v41 = vpack.c.bf16 %v619_v38, %v618_v37  ;;  %v620_v43 = vld [vmem:[%s1470_s24 + $0x60] sm:$0xff]  ;;  %1325 = vset.pattern.permute.xlu0 %v1363_v27 }
  0x3f   : > { %v1229_v42 = vpack.c.bf16 %v511_v40, %v510_v39  ;;  %v621_v44 = vld [vmem:[%s1470_s24 + $0x68] sm:$0xff]  ;;  %v494_v47 = vld [vmem:[%s1447_s14 + $0x10] sm:$0xff]  ;;  %v495_v48 = vld [vmem:[%s1447_s14 + $0x18] sm:$0xff]  ;;  %1326 = vset.pattern.permute.xlu1 %v1363_v27 }
  0x40   : > { %1240 = vmatpush3.bf16.msra.mxu1 %v1237_v17  ;;  %v1257_v45 = vpack.c.bf16 %v621_v44, %v620_v43  ;;  %v493_v46 = vld [vmem:[%s1447_s14 + $0x8] sm:$0xff]  ;;  %v622_v49 = vld [vmem:[%s1470_s24 + $0x70] sm:$0xff]  ;;  %v623_v50 = vld [vmem:[%s1470_s24 + $0x78] sm:$0xff] }
  0x41   : > { %1212 = vmatpush3.bf16.msra.mxu0 %v1209_v8  ;;  %1242 = vmatprep.subr.bf16.mxu1 %v1241_v23  ;;  %v1261_v51 = vpack.c.bf16 %v623_v50, %v622_v49  ;;  %v720_v52 = vld [vmem:[%s1486_s15] sm:$0xff]  ;;  %v721_v53 = vld [vmem:[%s1486_s15 + $0x8] sm:$0xff]  ;;  %v722_v54 = vld [vmem:[%s1486_s15 + $0x10] sm:$0xff] }
  0x42   : > { %1214 = vmatprep.subr.bf16.mxu0 %v1213_v18  ;;  %v1265_v55 = vpack.c.bf16 %v721_v53, %v720_v52  ;;  %v723_v56 = vld [vmem:[%s1486_s15 + $0x18] sm:$0xff]  ;;  %v724_v58 = vld [vmem:[%s1486_s15 + $0x20] sm:$0xff]  ;;  %v725_v59 = vld [vmem:[%s1486_s15 + $0x28] sm:$0xff] }
  0x43   : > { %v1269_v57 = vpack.c.bf16 %v723_v56, %v722_v54  ;;  %v1273_v60 = vpack.c.bf16 %v725_v59, %v724_v58  ;;  %v726_v61 = vld [vmem:[%s1486_s15 + $0x30] sm:$0xff]  ;;  %v727_v62 = vld [vmem:[%s1486_s15 + $0x38] sm:$0xff]  ;;  %v728_v0 = vld [vmem:[%s1486_s15 + $0x40] sm:$0xff] }
  0x44   : > { %1244 = vmatpush3.bf16.msra.mxu1 %v1241_v23  ;;  %v1277_v63 = vpack.c.bf16 %v727_v62, %v726_v61  ;;  %v729_v1 = vld [vmem:[%s1486_s15 + $0x48] sm:$0xff]  ;;  %v730_v3 = vld [vmem:[%s1486_s15 + $0x50] sm:$0xff]  ;;  %v731_v4 = vld [vmem:[%s1486_s15 + $0x58] sm:$0xff] }
  0x45   : > { %1216 = vmatpush3.bf16.msra.mxu0 %v1213_v18  ;;  %1246 = vmatprep.subr.bf16.mxu1 %v1245_v29  ;;  %v1281_v2 = vpack.c.bf16 %v729_v1, %v728_v0  ;;  %v1285_v5 = vpack.c.bf16 %v731_v4, %v730_v3  ;;  %v732_v6 = vld [vmem:[%s1486_s15 + $0x60] sm:$0xff]  ;;  %v733_v7 = vld [vmem:[%s1486_s15 + $0x68] sm:$0xff]  ;;  %v734_v22 = vld [vmem:[%s1486_s15 + $0x70] sm:$0xff] }
  0x46   : > { %1218 = vmatprep.subr.bf16.mxu0 %v1217_v24  ;;  %v1289_v8 = vpack.c.bf16 %v733_v7, %v732_v6  ;;  %v1018_v9 = vld [vmem:[%s1590_s30] ss:$0 sm:$0xff]  ;;  %v735_v23 = vld [vmem:[%s1486_s15 + $0x78] sm:$0xff]  ;;  %v830_v26 = vld [vmem:[%s1452_s17 + $0x10] sm:$0xff] }
  0x47   : > { %v828_v25 = vld [vmem:[%s1452_s17] sm:$0xff]  ;;  %844 = vperm.xlu1 %1326, %v830_v26   ;;  %v829_v28 = vld [vmem:[%s1452_s17 + $0x8] sm:$0xff] }
  0x48   : > { %1248 = vmatpush3.bf16.msra.mxu1 %v1245_v29  ;;  %834 = vperm.xlu0 %1325, %v828_v25   ;;  %v831_v29 = vld [vmem:[%s1452_s17 + $0x18] sm:$0xff]  ;;  %v1020_v44 = vld [vmem:[%s479_s2] ss:$0 sm:$0xff] }
  0x49   : > { %1220 = vmatpush3.bf16.msra.mxu0 %v1217_v24  ;;  %1250 = vmatprep.subr.bf16.mxu1 %v1249_v35  ;;  %v1293_v24 = vpack.c.bf16 %v735_v23, %v734_v22 }
  0x4a   : > { %1222 = vmatprep.subr.bf16.mxu0 %v1221_v30 }
  0x4b   : > { %849 = vperm.xlu1 %1326, %v831_v29  }
  0x4c   : > { %1252 = vmatpush3.bf16.msra.mxu1 %v1249_v35  ;;  %839 = vperm.xlu0 %1325, %v829_v28  }
  0x4d   : > { %1224 = vmatpush3.bf16.msra.mxu0 %v1221_v30  ;;  %1254 = vmatprep.subr.bf16.mxu1 %v1253_v41  ;;  %v1019_v30 = vld [vmem:[%s467_s18] ss:$0 sm:$0xff] }
  0x4e   : > { %1226 = vmatprep.subr.bf16.mxu0 %v1225_v36 }
  0x50   : > { %1256 = vmatpush3.bf16.msra.mxu1 %v1253_v41 }
  0x51   : > { %1228 = vmatpush3.bf16.msra.mxu0 %v1225_v36  ;;  %1258 = vmatprep.subr.bf16.mxu1 %v1257_v45 }
  0x52   : > { %1230 = vmatprep.subr.bf16.mxu0 %v1229_v42 }
  0x54   : > { %1260 = vmatpush3.bf16.msra.mxu1 %v1257_v45 }
  0x55   : > { %1232 = vmatpush3.bf16.msra.mxu0 %v1229_v42  ;;  %1262 = vmatprep.subr.bf16.mxu1 %v1261_v51 }
  0x56   : > { %1266 = vmatprep.subr.bf16.mxu0 %v1265_v55 }
  0x58   : > { %1120 = vmatmul.mubr.f32.vlgmr.msra.gmra.mrb[0].mxu0 %v493_v46  ;;  %1264 = vmatpush3.bf16.msra.mxu1 %v1261_v51 }
  0x59   : > { %1122 = vmatprep.mubr.f32.mxu0 %v494_v47  ;;  %1297 = vmatprep.subr.bf16.mxu1 %v1265_v55 }
  0x5a   : > { %1268 = vmatpush3.bf16.msra.mxu0 %v1265_v55 }
  0x5b   : > { %1270 = vmatprep.subr.bf16.mxu0 %v1269_v57 }
  0x5c   : > { %1123 = vmatmul.mubr.f32.gmra.mrb[2].mxu0 %v495_v48 }
  0x5e   : > { %1272 = vmatpush3.bf16.msra.mxu0 %v1269_v57 }
  0x5f   : > { %1274 = vmatprep.subr.bf16.mxu0 %v1273_v60 }
  0x62   : > { %1276 = vmatpush3.bf16.msra.mxu0 %v1273_v60 }
  0x63   : > { %1278 = vmatprep.subr.bf16.mxu0 %v1277_v63 }
  0x66   : > { %1280 = vmatpush3.bf16.msra.mxu0 %v1277_v63 }
  0x67   : > { %1282 = vmatprep.subr.bf16.mxu0 %v1281_v2 }
  0x6a   : > { %1284 = vmatpush3.bf16.msra.mxu0 %v1281_v2 }
  0x6b   : > { %1286 = vmatprep.subr.bf16.mxu0 %v1285_v5 }
  0x6e   : > { %1288 = vmatpush3.bf16.msra.mxu0 %v1285_v5 }
  0x6f   : > { %1290 = vmatprep.subr.bf16.mxu0 %v1289_v8 }
  0x72   : > { %1292 = vmatpush3.bf16.msra.mxu0 %v1289_v8 }
  0x73   : > { %1294 = vmatprep.subr.bf16.mxu0 %v1293_v24 }
  0x76   : > { %1296 = vmatpush3.bf16.msra.mxu0 %v1293_v24 }
  0xc6   : > { %v845_v45 = vpop.permute.xlu1 %844 }
  0xc7   : > { %v835_v43 = vpop.permute.xlu0 %834 }
  0xca   : > { %v850_v56 = vpop.permute.xlu1 %849 }
  0xcb   : > { %v840_v47 = vpop.permute.xlu0 %839 }
 0x12b   : > { %v1121_v10 = vpop.f32.mrb[0].mxu0 }
 0x12c   : > { %v591_v11 = vadd.f32 %v1121_v10, %v1018_v9  ;;  %v585_v12 = vpop.f32.mrb[1].mxu0 }
 0x12d   : > { %v586_v13 = vadd.f32 %v1018_v9, %v585_v12 }
 0x12e   : > { %v605_v16 = vmax.f32 %v591_v11, 0.0 }
 0x12f   : > { %v1124_v14 = vpop.f32.mrb[2].mxu0  ;;  %v604_v15 = vmax.f32 %v586_v13, 0.0 }
 0x130   : > { %v601_v17 = vadd.f32 %v1124_v14, %v1018_v9  ;;  %v595_v18 = vpop.f32.mrb[3].mxu0 }
 0x131   : > { %v596_v19 = vadd.f32 %v1018_v9, %v595_v18  ;;  %1157 = vmatprep.mubr.f32.mxu1 %v604_v15 }
 0x132   : > { %1158 = vmatmul.mubr.f32.vlgmr.msra.gmra.mrb[0].mxu1 %v605_v16  ;;  %v607_v21 = vmax.f32 %v601_v17, 0.0 }
 0x133   : > { %v606_v20 = vmax.f32 %v596_v19, 0.0  ;;  %1305 = vmatpush3.bf16.msra.mxu1 %v1265_v55 }
 0x134   : > { %1298 = vmatprep.subr.bf16.mxu1 %v1269_v57 }
 0x135   : > { %1160 = vmatprep.mubr.f32.mxu1 %v606_v20 }
 0x136   : > { %1161 = vmatmul.mubr.f32.gmra.mrb[2].mxu1 %v607_v21 }
 0x137   : > { %1306 = vmatpush3.bf16.msra.mxu1 %v1269_v57 }
 0x138   : > { %1299 = vmatprep.subr.bf16.mxu1 %v1273_v60 }
 0x13b   : > { %1307 = vmatpush3.bf16.msra.mxu1 %v1273_v60 }
 0x13c   : > { %1300 = vmatprep.subr.bf16.mxu1 %v1277_v63 }
 0x13f   : > { %1308 = vmatpush3.bf16.msra.mxu1 %v1277_v63 }
 0x140   : > { %1301 = vmatprep.subr.bf16.mxu1 %v1281_v2 }
 0x143   : > { %1309 = vmatpush3.bf16.msra.mxu1 %v1281_v2 }
 0x144   : > { %1302 = vmatprep.subr.bf16.mxu1 %v1285_v5 }
 0x147   : > { %1310 = vmatpush3.bf16.msra.mxu1 %v1285_v5 }
 0x148   : > { %1303 = vmatprep.subr.bf16.mxu1 %v1289_v8 }
 0x14b   : > { %1311 = vmatpush3.bf16.msra.mxu1 %v1289_v8 }
 0x14c   : > { %1304 = vmatprep.subr.bf16.mxu1 %v1293_v24 }
 0x14f   : > { %1312 = vmatpush3.bf16.msra.mxu1 %v1293_v24 }
 0x205   : > { %v1159_v31 = vpop.f32.mrb[0].mxu1 }
 0x206   : > { %v703_v32 = vadd.f32 %v1159_v31, %v1019_v30  ;;  %v697_v33 = vpop.f32.mrb[1].mxu1 }
 0x207   : > { %v698_v34 = vadd.f32 %v1019_v30, %v697_v33 }
 0x208   : > { %v717_v37 = vmax.f32 %v703_v32, 0.0 }
 0x209   : > { %v716_v35 = vmax.f32 %v698_v34, 0.0  ;;  %v1162_v36 = vpop.f32.mrb[2].mxu1 }
 0x20a   : > { %v713_v38 = vadd.f32 %v1162_v36, %v1019_v30  ;;  %v707_v39 = vpop.f32.mrb[3].mxu1 }
 0x20b   : > { %v708_v40 = vadd.f32 %v1019_v30, %v707_v39  ;;  %1195 = vmatprep.mubr.f32.mxu0 %v716_v35 }
 0x20c   : > { %1196 = vmatmul.mubr.f32.vlgmr.msra.gmra.mrb[4].mxu0 %v717_v37  ;;  %v719_v42 = vmax.f32 %v713_v38, 0.0 }
 0x20d   : > { %v718_v41 = vmax.f32 %v708_v40, 0.0 }
 0x20f   : > { %1198 = vmatprep.mubr.f32.mxu1 %v718_v41 }
 0x210   : > { %1199 = vmatmul.mubr.f32.vlgmr.msra.gmra.mrb[4].mxu1 %v719_v42 }
 0x2df   : > { %v1197_v46 = vpop.f32.mrb[4].mxu0 }
 0x2e0   : > { %v815_v48 = vadd.f32 %v1197_v46, %v1020_v44  ;;  %v809_v49 = vpop.f32.mrb[5].mxu0 }
 0x2e1   : > { %v810_v50 = vadd.f32 %v1020_v44, %v809_v49 }
 0x2e2   : > { %v853_v51 = vmul.f32 %v840_v47, %v815_v48 }
 0x2e3   : > { %v852_v52 = vmul.f32 %v835_v43, %v810_v50  ;;  %v1200_v53 = vpop.f32.mrb[4].mxu1 }
 0x2e4   : > { %857 = vst [vmem:[%s1481_s23 + $0x8] sm:$0xff] %v853_v51  ;;  %v825_v54 = vadd.f32 %v1200_v53, %v1020_v44  ;;  %v819_v55 = vpop.f32.mrb[5].mxu1 }
 0x2e5   : > { %856 = vst [vmem:[%s1481_s23] sm:$0xff] %v852_v52  ;;  %v820_v57 = vadd.f32 %v1020_v44, %v819_v55 }
 0x2e6   : > { %v855_v58 = vmul.f32 %v850_v56, %v825_v54 }
 0x2e7   : > { %v854_v59 = vmul.f32 %v845_v45, %v820_v57 }
 0x2e8   : > { %859 = vst [vmem:[%s1481_s23 + $0x18] sm:$0xff] %v855_v58 }
 0x2e9   : > { %858 = vst [vmem:[%s1481_s23 + $0x10] sm:$0xff] %v854_v59 }
 0x2ea PF: > { %s860_s29 = sld [smem:[#allocation4 + %s1432_s22]] }
 0x2f0   : > { %p1021_p7 = scmp.ne.s32.totalorder %s860_s29, 0 }
 0x2f1   : > { %v1364_v60 = vmov (!%p1021_p7), 0.0  }
 0x2f2   : > { %864 = sbr.rel (%p1021_p7) target bundleno = 761 (0x2f9), region = 60  ;;  %865 = vst [vmem:[%s1481_s23] sm:$0xff] (!%p1021_p7), %v1364_v60  ;;  %866 = vst [vmem:[%s1481_s23 + $0x8] sm:$0xff] (!%p1021_p7), %v1364_v60 }
 0x2f3   : > { %867 = vst [vmem:[%s1481_s23 + $0x10] sm:$0xff] (!%p1021_p7), %v1364_v60  ;;  %868 = vst [vmem:[%s1481_s23 + $0x18] sm:$0xff] (!%p1021_p7), %v1364_v60 }
 0x2f9 PF: > { %s30_s1 = sadd.s32 1, %s1359_s1  }
 0x2fa   : > { %p27_p8 = scmp.ge.s32.totalorder %s30_s1, 13  }
 0x2fc   :  { %29 = sbr.rel (!%p27_p8) target bundleno = 27 (0x1b), region = 111 }

</bundles_post_ra>
